<compile_context>
chip_gen: v7x
topology: tpu7x:2x2x1
jax: 0.10.0
libtpu: 0.0.40
codegen_flags: <defaults>
</compile_context>

<pallas_src>
import functools

import jax
import jax.numpy as jnp
from jax import lax
from jax.experimental import pallas as pl
from jax.experimental.pallas import tpu as pltpu

EPS = 1e-5


def _bn_relu(acc, gamma, beta, maskf, count):
    """Training-mode BatchNorm (biased variance over real batch pixels) + ReLU.

    acc   : (Cout, Q) f32 conv output over the padded flat grid (conv bias
            omitted — it cancels exactly under training-mode BN).
    maskf : (1, Q) f32, 1.0 on real output positions, 0.0 on halo/garbage ones.
    Per-channel scale/shift are hoisted so the apply is 1 FMA + 1 max.
    """
    inv = 1.0 / count
    am = acc * maskf                                   # masked product, reused
    s1 = jnp.sum(am, axis=1, keepdims=True)            # (Cout, 1)
    s2 = jnp.sum(am * acc, axis=1, keepdims=True)      # (Cout, 1)
    mean = s1 * inv
    # NOTE: single-pass E[x^2]-mean^2 in f32; guard against cancellation.
    var = jnp.maximum(s2 * inv - mean * mean, 0.0)
    scale = gamma * lax.rsqrt(var + EPS)               # (Cout, 1)
    shift = beta - mean * scale
    return jnp.maximum(acc * scale + shift, 0.0)


def conv_block_kernel(x_ref, mask_ref, w1_ref, g1_ref, be1_ref,
                      w2_ref, g2_ref, be2_ref, out_ref,
                      ypad_ref, slab1_ref, slab2_ref, *, Wp, count):
    """Fused double conv + BN + ReLU.

    x_ref    : (Cin, Ltot) bf16  batch-stacked, per-image halo-padded, flat.
    mask_ref : (1, Q) f32        1.0 on real output positions.
    w*_ref   : (Cout, 9*C) bf16  row index = (3*dy+dx)*C + c.
    out_ref  : (Cout, Q) f32     Q = N*(H+2)*(W+2)  (padded flat grid).
    """
    Cin = x_ref.shape[0]
    Cout, Q = out_ref.shape
    Ltot = ypad_ref.shape[1]
    maskf = mask_ref[...]

    # ---- conv1: 9 contiguous im2col lane-slices + ONE MXU matmul for the batch.
    # TODO(synk): slab-free variant (9 accumulating K=C matmuls on shifted views)
    # trades slab ld/st for matmul count; attractive on v7x (MRB) — measure.
    for dy in range(3):
        for dx in range(3):
            k = 3 * dy + dx
            off = dy * Wp + dx
            slab1_ref[k * Cin:(k + 1) * Cin, :] = x_ref[:, off:off + Q]
    acc = jnp.dot(w1_ref[...], slab1_ref[...],
                  preferred_element_type=jnp.float32)          # (Cout, Q)

    # ---- bn1 + relu
    y1 = _bn_relu(acc, g1_ref[...], be1_ref[...], maskf, count)

    # ---- conv2: re-pad bn1 output into the padded flat layout.
    # The masked (garbage) positions of y1 land exactly on the halo positions of
    # the padded layout, so one contiguous masked store builds the whole
    # interior; only two thin edge strips are zeroed explicitly.
    ypad_ref[:, 0:Wp + 1] = jnp.zeros((Cout, Wp + 1), ypad_ref.dtype)
    ypad_ref[:, Wp + 1:Wp + 1 + Q] = (y1 * maskf).astype(ypad_ref.dtype)
    ypad_ref[:, Wp + 1 + Q:Ltot] = jnp.zeros((Cout, Ltot - Wp - 1 - Q),
                                             ypad_ref.dtype)

    for dy in range(3):
        for dx in range(3):
            k = 3 * dy + dx
            off = dy * Wp + dx
            slab2_ref[k * Cout:(k + 1) * Cout, :] = ypad_ref[:, off:off + Q]
    acc2 = jnp.dot(w2_ref[...], slab2_ref[...],
                   preferred_element_type=jnp.float32)         # (Cout, Q)

    # ---- bn2 + relu, lane-dense store
    out_ref[...] = _bn_relu(acc2, g2_ref[...], be2_ref[...], maskf, count)


@jax.jit
def conv_block_pallas(x_nchw, w1, b1, g1, be1, w2, b2, g2, be2):
    """Forward pass of `conv_block`.  x_nchw: (N, Cin, H, W) f32, NCHW.
    Conv weights in PyTorch OIHW layout, BN in training mode (batch stats).
    Returns (N, Cout, H, W) f32.  (b1/b2 are accepted for API fidelity but are
    mathematically irrelevant: a per-channel constant cancels under BN.)"""
    del b1, b2
    N, Cin, H, W = x_nchw.shape
    Cout = w1.shape[0]
    Hp, Wp = H + 2, W + 2
    Q = N * Hp * Wp                    # padded flat grid (batch stacked on lanes)
    Ltot = Q + 2 * Wp + 2              # minimal length read by the dy=2,dx=2 shift

    # Full halo pad hoisted here (fuses with the bf16 cast); channel-planar,
    # per-image-padded images stacked contiguously along the flat lane axis.
    xp = jnp.pad(x_nchw, ((0, 0), (0, 0), (1, 1), (1, 1)))
    xp = jnp.transpose(xp, (1, 0, 2, 3)).reshape(Cin, Q)
    xp = jnp.pad(xp, ((0, 0), (0, Ltot - Q))).astype(jnp.bfloat16)

    # OIHW -> (Cout, 9*Cin), row index = (3*dy + dx)*Cin + cin, bf16 for the MXU.
    def prep_w(w):
        co, ci = w.shape[0], w.shape[1]
        return jnp.transpose(w, (0, 2, 3, 1)).reshape(co, 9 * ci).astype(jnp.bfloat16)

    col = lambda v: v.reshape(-1, 1).astype(jnp.float32)

    # 1.0 on real output positions (real row AND real col of some image).
    q_idx = jnp.arange(Q, dtype=jnp.int32)
    mask = (((q_idx // Wp) % Hp < H) & (q_idx % Wp < W))
    mask = mask.astype(jnp.float32).reshape(1, Q)

    kernel = functools.partial(conv_block_kernel, Wp=Wp, count=float(N * H * W))
    vmem = pl.BlockSpec(memory_space=pltpu.MemorySpace.VMEM)

    # VMEM budget from the actual footprint (inputs + output + scratch + temps),
    # with headroom, capped at v7x's 64 MiB per-TC VMEM.
    bytes_bf16 = 2 * (Cin * Ltot + Cout * Ltot + 9 * Cin * Q + 9 * Cout * Q
                      + 9 * Cin * Cout + 9 * Cout * Cout)
    bytes_f32 = 4 * (Q + 3 * Cout * Q + 4 * Cout)
    vmem_limit = int(min(64 * 2**20, max(4 * 2**20, 4 * (bytes_bf16 + bytes_f32))))

    out_flat = pl.pallas_call(
        kernel,
        out_shape=jax.ShapeDtypeStruct((Cout, Q), jnp.float32),
        in_specs=[vmem] * 8,
        out_specs=vmem,
        scratch_shapes=[
            pltpu.VMEM((Cout, Ltot), jnp.bfloat16),      # conv2 halo buffer
            pltpu.VMEM((9 * Cin, Q), jnp.bfloat16),      # conv1 im2col slab
            pltpu.VMEM((9 * Cout, Q), jnp.bfloat16),     # conv2 im2col slab
        ],
        compiler_params=pltpu.CompilerParams(vmem_limit_bytes=vmem_limit),
    )(xp, mask, prep_w(w1), col(g1), col(be1), prep_w(w2), col(g2), col(be2))

    # TODO(synk): at production sizes fuse this crop/transpose into the consumer
    # (or have the tiled kernel write only the real columns) instead of this
    # XLA-side copy.
    out = out_flat.reshape(Cout, N, Hp, Wp)[:, :, :H, :W]
    return jnp.transpose(out, (1, 0, 2, 3))


def conv_block_ref(x, w1, b1, g1, be1, w2, b2, g2, be2,
                   compute_dtype=jnp.float32):
    """Pure-JAX reference (NCHW), same semantics as the PyTorch module.
    compute_dtype controls the conv input/weight precision (the kernel feeds
    bf16 to the MXU with fp32 accumulation)."""
    def conv(x, w, b):
        y = lax.conv_general_dilated(
            x.astype(compute_dtype), w.astype(compute_dtype),
            window_strides=(1, 1), padding=((1, 1), (1, 1)),
            dimension_numbers=("NCHW", "OIHW", "NCHW"),
            preferred_element_type=jnp.float32)
        return y + b[None, :, None, None]

    def bn_relu(x, g, bta):
        mean = x.mean(axis=(0, 2, 3), keepdims=True)
        var = ((x - mean) ** 2).mean(axis=(0, 2, 3), keepdims=True)
        y = (x - mean) * lax.rsqrt(var + EPS) * g[None, :, None, None] \
            + bta[None, :, None, None]
        return jnp.maximum(y, 0.0)

    x = bn_relu(conv(x, w1, b1), g1, be1)
    x = bn_relu(conv(x, w2, b2), g2, be2)
    return x


if __name__ == "__main__":
    N, Cin, Cout, H, W = 2, 4, 8, 16, 16

    key = jax.random.PRNGKey(0)
    kx, kw1, kb1, kw2, kb2 = jax.random.split(key, 5)

    x = jax.random.normal(kx, (N, Cin, H, W), jnp.float32)
    # Shapes follow nn.Conv2d / nn.BatchNorm2d (default BN init: gamma=1, beta=0).
    w1 = 0.1 * jax.random.normal(kw1, (Cout, Cin, 3, 3), jnp.float32)
    b1 = 0.05 * jax.random.normal(kb1, (Cout,), jnp.float32)
    w2 = 0.1 * jax.random.normal(kw2, (Cout, Cout, 3, 3), jnp.float32)
    b2 = 0.05 * jax.random.normal(kb2, (Cout,), jnp.float32)
    g1 = jnp.ones((Cout,), jnp.float32)
    be1 = jnp.zeros((Cout,), jnp.float32)
    g2 = jnp.ones((Cout,), jnp.float32)
    be2 = jnp.zeros((Cout,), jnp.float32)

    out = jax.block_until_ready(
        conv_block_pallas(x, w1, b1, g1, be1, w2, b2, g2, be2))
    assert out.shape == (N, Cout, H, W), out.shape

    # Matched-precision reference (bf16 conv operands, fp32 accumulation + BN):
    # only summation order / re-rounding of the intermediate differ -> tight.
    ref_bf = jax.block_until_ready(
        conv_block_ref(x, w1, b1, g1, be1, w2, b2, g2, be2,
                       compute_dtype=jnp.bfloat16))
    err_bf = float(jnp.max(jnp.abs(out - ref_bf)))
    assert jnp.allclose(out, ref_bf, atol=1e-2, rtol=1e-2), err_bf

    # Full-fp32 reference (exact PyTorch semantics, conv biases included):
    # the only deviation is the bf16 cast of the MXU operands.
    ref_32 = jax.block_until_ready(
        conv_block_ref(x, w1, b1, g1, be1, w2, b2, g2, be2,
                       compute_dtype=jnp.float32))
    err_32 = float(jnp.max(jnp.abs(out - ref_32)))
    assert jnp.allclose(out, ref_32, atol=1e-1, rtol=1e-1), err_32

    print("KERNEL_OK")
</pallas_src>

<mosaic_0001>
module attributes {stable_mosaic.version = 11 : i64} {
  func.func @conv_block_kernel(%arg0: memref<4x686xbf16, #tpu.memory_space<vmem>>, %arg1: memref<1x648xf32, #tpu.memory_space<vmem>>, %arg2: memref<8x36xbf16, #tpu.memory_space<vmem>>, %arg3: memref<8x1xf32, #tpu.memory_space<vmem>>, %arg4: memref<8x1xf32, #tpu.memory_space<vmem>>, %arg5: memref<8x72xbf16, #tpu.memory_space<vmem>>, %arg6: memref<8x1xf32, #tpu.memory_space<vmem>>, %arg7: memref<8x1xf32, #tpu.memory_space<vmem>>, %arg8: memref<8x648xf32, #tpu.memory_space<vmem>>, %arg9: memref<8x686xbf16, #tpu.memory_space<vmem>>, %arg10: memref<36x648xbf16, #tpu.memory_space<vmem>>, %arg11: memref<72x648xbf16, #tpu.memory_space<vmem>>) attributes {dimension_semantics = [], scalar_prefetch = 0 : i64, scratch_operands = 3 : i64, tpu.core_type = #tpu.core_type<tc>} {
    %c0 = arith.constant 0 : index
    %c0_0 = arith.constant 0 : index
    %0 = vector.load %arg1[%c0, %c0_0] : memref<1x648xf32, #tpu.memory_space<vmem>>, vector<1x648xf32>
    %c0_1 = arith.constant 0 : index
    %c0_2 = arith.constant 0 : index
    %1 = vector.load %arg0[%c0_1, %c0_2] : memref<4x686xbf16, #tpu.memory_space<vmem>>, vector<4x648xbf16>
    %c0_3 = arith.constant 0 : index
    %c0_4 = arith.constant 0 : index
    %2 = vector.load %arg10[%c0_3, %c0_4] : memref<36x648xbf16, #tpu.memory_space<vmem>>, vector<4x648xbf16>
    tpu.vector_store %arg10[%c0_3, %c0_4], %1 {strides = array<i32>} : memref<36x648xbf16, #tpu.memory_space<vmem>>, vector<4x648xbf16>,
    %c0_5 = arith.constant 0 : index
    %c1 = arith.constant 1 : index
    %3 = vector.load %arg0[%c0_5, %c1] : memref<4x686xbf16, #tpu.memory_space<vmem>>, vector<4x648xbf16>
    %c4 = arith.constant 4 : index
    %c0_6 = arith.constant 0 : index
    %4 = vector.load %arg10[%c4, %c0_6] : memref<36x648xbf16, #tpu.memory_space<vmem>>, vector<4x648xbf16>
    tpu.vector_store %arg10[%c4, %c0_6], %3 {strides = array<i32>} : memref<36x648xbf16, #tpu.memory_space<vmem>>, vector<4x648xbf16>,
    %c0_7 = arith.constant 0 : index
    %c2 = arith.constant 2 : index
    %5 = vector.load %arg0[%c0_7, %c2] : memref<4x686xbf16, #tpu.memory_space<vmem>>, vector<4x648xbf16>
    %c8 = arith.constant 8 : index
    %c0_8 = arith.constant 0 : index
    %6 = vector.load %arg10[%c8, %c0_8] : memref<36x648xbf16, #tpu.memory_space<vmem>>, vector<4x648xbf16>
    tpu.vector_store %arg10[%c8, %c0_8], %5 {strides = array<i32>} : memref<36x648xbf16, #tpu.memory_space<vmem>>, vector<4x648xbf16>,
    %c0_9 = arith.constant 0 : index
    %c18 = arith.constant 18 : index
    %7 = vector.load %arg0[%c0_9, %c18] : memref<4x686xbf16, #tpu.memory_space<vmem>>, vector<4x648xbf16>
    %c12 = arith.constant 12 : index
    %c0_10 = arith.constant 0 : index
    %8 = vector.load %arg10[%c12, %c0_10] : memref<36x648xbf16, #tpu.memory_space<vmem>>, vector<4x648xbf16>
    tpu.vector_store %arg10[%c12, %c0_10], %7 {strides = array<i32>} : memref<36x648xbf16, #tpu.memory_space<vmem>>, vector<4x648xbf16>,
    %c0_11 = arith.constant 0 : index
    %c19 = arith.constant 19 : index
    %9 = vector.load %arg0[%c0_11, %c19] : memref<4x686xbf16, #tpu.memory_space<vmem>>, vector<4x648xbf16>
    %c16 = arith.constant 16 : index
    %c0_12 = arith.constant 0 : index
    %10 = vector.load %arg10[%c16, %c0_12] : memref<36x648xbf16, #tpu.memory_space<vmem>>, vector<4x648xbf16>
    tpu.vector_store %arg10[%c16, %c0_12], %9 {strides = array<i32>} : memref<36x648xbf16, #tpu.memory_space<vmem>>, vector<4x648xbf16>,
    %c0_13 = arith.constant 0 : index
    %c20 = arith.constant 20 : index
    %11 = vector.load %arg0[%c0_13, %c20] : memref<4x686xbf16, #tpu.memory_space<vmem>>, vector<4x648xbf16>
    %c20_14 = arith.constant 20 : index
    %c0_15 = arith.constant 0 : index
    %12 = vector.load %arg10[%c20_14, %c0_15] : memref<36x648xbf16, #tpu.memory_space<vmem>>, vector<4x648xbf16>
    tpu.vector_store %arg10[%c20_14, %c0_15], %11 {strides = array<i32>} : memref<36x648xbf16, #tpu.memory_space<vmem>>, vector<4x648xbf16>,
    %c0_16 = arith.constant 0 : index
    %c36 = arith.constant 36 : index
    %13 = vector.load %arg0[%c0_16, %c36] : memref<4x686xbf16, #tpu.memory_space<vmem>>, vector<4x648xbf16>
    %c24 = arith.constant 24 : index
    %c0_17 = arith.constant 0 : index
    %14 = vector.load %arg10[%c24, %c0_17] : memref<36x648xbf16, #tpu.memory_space<vmem>>, vector<4x648xbf16>
    tpu.vector_store %arg10[%c24, %c0_17], %13 {strides = array<i32>} : memref<36x648xbf16, #tpu.memory_space<vmem>>, vector<4x648xbf16>,
    %c0_18 = arith.constant 0 : index
    %c37 = arith.constant 37 : index
    %15 = vector.load %arg0[%c0_18, %c37] : memref<4x686xbf16, #tpu.memory_space<vmem>>, vector<4x648xbf16>
    %c28 = arith.constant 28 : index
    %c0_19 = arith.constant 0 : index
    %16 = vector.load %arg10[%c28, %c0_19] : memref<36x648xbf16, #tpu.memory_space<vmem>>, vector<4x648xbf16>
    tpu.vector_store %arg10[%c28, %c0_19], %15 {strides = array<i32>} : memref<36x648xbf16, #tpu.memory_space<vmem>>, vector<4x648xbf16>,
    %c0_20 = arith.constant 0 : index
    %c38 = arith.constant 38 : index
    %17 = vector.load %arg0[%c0_20, %c38] : memref<4x686xbf16, #tpu.memory_space<vmem>>, vector<4x648xbf16>
    %c32 = arith.constant 32 : index
    %c0_21 = arith.constant 0 : index
    %18 = vector.load %arg10[%c32, %c0_21] : memref<36x648xbf16, #tpu.memory_space<vmem>>, vector<4x648xbf16>
    tpu.vector_store %arg10[%c32, %c0_21], %17 {strides = array<i32>} : memref<36x648xbf16, #tpu.memory_space<vmem>>, vector<4x648xbf16>,
    %c0_22 = arith.constant 0 : index
    %c0_23 = arith.constant 0 : index
    %19 = vector.load %arg2[%c0_22, %c0_23] : memref<8x36xbf16, #tpu.memory_space<vmem>>, vector<8x36xbf16>
    %c0_24 = arith.constant 0 : index
    %c0_25 = arith.constant 0 : index
    %20 = vector.load %arg10[%c0_24, %c0_25] : memref<36x648xbf16, #tpu.memory_space<vmem>>, vector<36x648xbf16>
    %cst = arith.constant dense<0.000000e+00> : vector<8x648xf32>
    %21 = tpu.matmul %19, %20, %cst {dimension_numbers = #tpu.dot_dimension_numbers<[1], [0], [0], [1], [0, 0, 1, 1], [], []>} : vector<8x36xbf16>, vector<36x648xbf16>, vector<8x648xf32> -> vector<8x648xf32>
    %c0_26 = arith.constant 0 : index
    %c0_27 = arith.constant 0 : index
    %22 = vector.load %arg3[%c0_26, %c0_27] : memref<8x1xf32, #tpu.memory_space<vmem>>, vector<8x1xf32>
    %c0_28 = arith.constant 0 : index
    %c0_29 = arith.constant 0 : index
    %23 = vector.load %arg4[%c0_28, %c0_29] : memref<8x1xf32, #tpu.memory_space<vmem>>, vector<8x1xf32>
    %24 = vector.broadcast %0 : vector<1x648xf32> to vector<8x648xf32>
    %25 = arith.mulf %21, %24 : vector<8x648xf32>
    %cst_30 = arith.constant dense<0.000000e+00> : vector<8xf32>
    %26 = vector.multi_reduction <add>, %25, %cst_30 [1] : vector<8x648xf32> to vector<8xf32>
    %27 = vector.shape_cast %26 : vector<8xf32> to vector<8x1xf32>
    %28 = arith.mulf %25, %21 : vector<8x648xf32>
    %cst_31 = arith.constant dense<0.000000e+00> : vector<8xf32>
    %29 = vector.multi_reduction <add>, %28, %cst_31 [1] : vector<8x648xf32> to vector<8xf32>
    %30 = vector.shape_cast %29 : vector<8xf32> to vector<8x1xf32>
    %cst_32 = arith.constant 0.001953125 : f32
    %31 = vector.broadcast %cst_32 : f32 to vector<8x1xf32>
    %32 = arith.mulf %27, %31 : vector<8x1xf32>
    %cst_33 = arith.constant 0.001953125 : f32
    %33 = vector.broadcast %cst_33 : f32 to vector<8x1xf32>
    %34 = arith.mulf %30, %33 : vector<8x1xf32>
    %35 = arith.mulf %32, %32 : vector<8x1xf32>
    %36 = arith.subf %34, %35 : vector<8x1xf32>
    %cst_34 = arith.constant 0.000000e+00 : f32
    %37 = vector.broadcast %cst_34 : f32 to vector<8x1xf32>
    %38 = arith.maximumf %36, %37 : vector<8x1xf32>
    %cst_35 = arith.constant 9.99999974E-6 : f32
    %39 = vector.broadcast %cst_35 : f32 to vector<8x1xf32>
    %40 = arith.addf %38, %39 : vector<8x1xf32>
    %41 = math.rsqrt %40 : vector<8x1xf32>
    %42 = arith.mulf %22, %41 : vector<8x1xf32>
    %43 = arith.mulf %32, %42 : vector<8x1xf32>
    %44 = arith.subf %23, %43 : vector<8x1xf32>
    %45 = vector.broadcast %42 : vector<8x1xf32> to vector<8x648xf32>
    %46 = arith.mulf %21, %45 : vector<8x648xf32>
    %47 = vector.broadcast %44 : vector<8x1xf32> to vector<8x648xf32>
    %48 = arith.addf %46, %47 : vector<8x648xf32>
    %cst_36 = arith.constant 0.000000e+00 : f32
    %49 = vector.broadcast %cst_36 : f32 to vector<8x648xf32>
    %50 = arith.maximumf %48, %49 : vector<8x648xf32>
    %cst_37 = arith.constant 0.000000e+00 : bf16
    %51 = vector.broadcast %cst_37 : bf16 to vector<8x19xbf16>
    %c0_38 = arith.constant 0 : index
    %c0_39 = arith.constant 0 : index
    %52 = vector.load %arg9[%c0_38, %c0_39] : memref<8x686xbf16, #tpu.memory_space<vmem>>, vector<8x19xbf16>
    tpu.vector_store %arg9[%c0_38, %c0_39], %51 {strides = array<i32>} : memref<8x686xbf16, #tpu.memory_space<vmem>>, vector<8x19xbf16>,
    %53 = vector.broadcast %0 : vector<1x648xf32> to vector<8x648xf32>
    %54 = arith.mulf %50, %53 : vector<8x648xf32>
    %55 = arith.truncf %54 : vector<8x648xf32> to vector<8x648xbf16>
    %c0_40 = arith.constant 0 : index
    %c19_41 = arith.constant 19 : index
    %56 = vector.load %arg9[%c0_40, %c19_41] : memref<8x686xbf16, #tpu.memory_space<vmem>>, vector<8x648xbf16>
    tpu.vector_store %arg9[%c0_40, %c19_41], %55 {strides = array<i32>} : memref<8x686xbf16, #tpu.memory_space<vmem>>, vector<8x648xbf16>,
    %cst_42 = arith.constant 0.000000e+00 : bf16
    %57 = vector.broadcast %cst_42 : bf16 to vector<8x19xbf16>
    %c0_43 = arith.constant 0 : index
    %c667 = arith.constant 667 : index
    %58 = vector.load %arg9[%c0_43, %c667] : memref<8x686xbf16, #tpu.memory_space<vmem>>, vector<8x19xbf16>
    tpu.vector_store %arg9[%c0_43, %c667], %57 {strides = array<i32>} : memref<8x686xbf16, #tpu.memory_space<vmem>>, vector<8x19xbf16>,
    %c0_44 = arith.constant 0 : index
    %c0_45 = arith.constant 0 : index
    %59 = vector.load %arg9[%c0_44, %c0_45] : memref<8x686xbf16, #tpu.memory_space<vmem>>, vector<8x648xbf16>
    %c0_46 = arith.constant 0 : index
    %c0_47 = arith.constant 0 : index
    %60 = vector.load %arg11[%c0_46, %c0_47] : memref<72x648xbf16, #tpu.memory_space<vmem>>, vector<8x648xbf16>
    tpu.vector_store %arg11[%c0_46, %c0_47], %59 {strides = array<i32>} : memref<72x648xbf16, #tpu.memory_space<vmem>>, vector<8x648xbf16>,
    %c0_48 = arith.constant 0 : index
    %c1_49 = arith.constant 1 : index
    %61 = vector.load %arg9[%c0_48, %c1_49] : memref<8x686xbf16, #tpu.memory_space<vmem>>, vector<8x648xbf16>
    %c8_50 = arith.constant 8 : index
    %c0_51 = arith.constant 0 : index
    %62 = vector.load %arg11[%c8_50, %c0_51] : memref<72x648xbf16, #tpu.memory_space<vmem>>, vector<8x648xbf16>
    tpu.vector_store %arg11[%c8_50, %c0_51], %61 {strides = array<i32>} : memref<72x648xbf16, #tpu.memory_space<vmem>>, vector<8x648xbf16>,
    %c0_52 = arith.constant 0 : index
    %c2_53 = arith.constant 2 : index
    %63 = vector.load %arg9[%c0_52, %c2_53] : memref<8x686xbf16, #tpu.memory_space<vmem>>, vector<8x648xbf16>
    %c16_54 = arith.constant 16 : index
    %c0_55 = arith.constant 0 : index
    %64 = vector.load %arg11[%c16_54, %c0_55] : memref<72x648xbf16, #tpu.memory_space<vmem>>, vector<8x648xbf16>
    tpu.vector_store %arg11[%c16_54, %c0_55], %63 {strides = array<i32>} : memref<72x648xbf16, #tpu.memory_space<vmem>>, vector<8x648xbf16>,
    %c0_56 = arith.constant 0 : index
    %c18_57 = arith.constant 18 : index
    %65 = vector.load %arg9[%c0_56, %c18_57] : memref<8x686xbf16, #tpu.memory_space<vmem>>, vector<8x648xbf16>
    %c24_58 = arith.constant 24 : index
    %c0_59 = arith.constant 0 : index
    %66 = vector.load %arg11[%c24_58, %c0_59] : memref<72x648xbf16, #tpu.memory_space<vmem>>, vector<8x648xbf16>
    tpu.vector_store %arg11[%c24_58, %c0_59], %65 {strides = array<i32>} : memref<72x648xbf16, #tpu.memory_space<vmem>>, vector<8x648xbf16>,
    %c0_60 = arith.constant 0 : index
    %c19_61 = arith.constant 19 : index
    %67 = vector.load %arg9[%c0_60, %c19_61] : memref<8x686xbf16, #tpu.memory_space<vmem>>, vector<8x648xbf16>
    %c32_62 = arith.constant 32 : index
    %c0_63 = arith.constant 0 : index
    %68 = vector.load %arg11[%c32_62, %c0_63] : memref<72x648xbf16, #tpu.memory_space<vmem>>, vector<8x648xbf16>
    tpu.vector_store %arg11[%c32_62, %c0_63], %67 {strides = array<i32>} : memref<72x648xbf16, #tpu.memory_space<vmem>>, vector<8x648xbf16>,
    %c0_64 = arith.constant 0 : index
    %c20_65 = arith.constant 20 : index
    %69 = vector.load %arg9[%c0_64, %c20_65] : memref<8x686xbf16, #tpu.memory_space<vmem>>, vector<8x648xbf16>
    %c40 = arith.constant 40 : index
    %c0_66 = arith.constant 0 : index
    %70 = vector.load %arg11[%c40, %c0_66] : memref<72x648xbf16, #tpu.memory_space<vmem>>, vector<8x648xbf16>
    tpu.vector_store %arg11[%c40, %c0_66], %69 {strides = array<i32>} : memref<72x648xbf16, #tpu.memory_space<vmem>>, vector<8x648xbf16>,
    %c0_67 = arith.constant 0 : index
    %c36_68 = arith.constant 36 : index
    %71 = vector.load %arg9[%c0_67, %c36_68] : memref<8x686xbf16, #tpu.memory_space<vmem>>, vector<8x648xbf16>
    %c48 = arith.constant 48 : index
    %c0_69 = arith.constant 0 : index
    %72 = vector.load %arg11[%c48, %c0_69] : memref<72x648xbf16, #tpu.memory_space<vmem>>, vector<8x648xbf16>
    tpu.vector_store %arg11[%c48, %c0_69], %71 {strides = array<i32>} : memref<72x648xbf16, #tpu.memory_space<vmem>>, vector<8x648xbf16>,
    %c0_70 = arith.constant 0 : index
    %c37_71 = arith.constant 37 : index
    %73 = vector.load %arg9[%c0_70, %c37_71] : memref<8x686xbf16, #tpu.memory_space<vmem>>, vector<8x648xbf16>
    %c56 = arith.constant 56 : index
    %c0_72 = arith.constant 0 : index
    %74 = vector.load %arg11[%c56, %c0_72] : memref<72x648xbf16, #tpu.memory_space<vmem>>, vector<8x648xbf16>
    tpu.vector_store %arg11[%c56, %c0_72], %73 {strides = array<i32>} : memref<72x648xbf16, #tpu.memory_space<vmem>>, vector<8x648xbf16>,
    %c0_73 = arith.constant 0 : index
    %c38_74 = arith.constant 38 : index
    %75 = vector.load %arg9[%c0_73, %c38_74] : memref<8x686xbf16, #tpu.memory_space<vmem>>, vector<8x648xbf16>
    %c64 = arith.constant 64 : index
    %c0_75 = arith.constant 0 : index
    %76 = vector.load %arg11[%c64, %c0_75] : memref<72x648xbf16, #tpu.memory_space<vmem>>, vector<8x648xbf16>
    tpu.vector_store %arg11[%c64, %c0_75], %75 {strides = array<i32>} : memref<72x648xbf16, #tpu.memory_space<vmem>>, vector<8x648xbf16>,
    %c0_76 = arith.constant 0 : index
    %c0_77 = arith.constant 0 : index
    %77 = vector.load %arg5[%c0_76, %c0_77] : memref<8x72xbf16, #tpu.memory_space<vmem>>, vector<8x72xbf16>
    %c0_78 = arith.constant 0 : index
    %c0_79 = arith.constant 0 : index
    %78 = vector.load %arg11[%c0_78, %c0_79] : memref<72x648xbf16, #tpu.memory_space<vmem>>, vector<72x648xbf16>
    %cst_80 = arith.constant dense<0.000000e+00> : vector<8x648xf32>
    %79 = tpu.matmul %77, %78, %cst_80 {dimension_numbers = #tpu.dot_dimension_numbers<[1], [0], [0], [1], [0, 0, 1, 1], [], []>} : vector<8x72xbf16>, vector<72x648xbf16>, vector<8x648xf32> -> vector<8x648xf32>
    %c0_81 = arith.constant 0 : index
    %c0_82 = arith.constant 0 : index
    %80 = vector.load %arg6[%c0_81, %c0_82] : memref<8x1xf32, #tpu.memory_space<vmem>>, vector<8x1xf32>
    %c0_83 = arith.constant 0 : index
    %c0_84 = arith.constant 0 : index
    %81 = vector.load %arg7[%c0_83, %c0_84] : memref<8x1xf32, #tpu.memory_space<vmem>>, vector<8x1xf32>
    %82 = vector.broadcast %0 : vector<1x648xf32> to vector<8x648xf32>
    %83 = arith.mulf %79, %82 : vector<8x648xf32>
    %cst_85 = arith.constant dense<0.000000e+00> : vector<8xf32>
    %84 = vector.multi_reduction <add>, %83, %cst_85 [1] : vector<8x648xf32> to vector<8xf32>
    %85 = vector.shape_cast %84 : vector<8xf32> to vector<8x1xf32>
    %86 = arith.mulf %83, %79 : vector<8x648xf32>
    %cst_86 = arith.constant dense<0.000000e+00> : vector<8xf32>
    %87 = vector.multi_reduction <add>, %86, %cst_86 [1] : vector<8x648xf32> to vector<8xf32>
    %88 = vector.shape_cast %87 : vector<8xf32> to vector<8x1xf32>
    %cst_87 = arith.constant 0.001953125 : f32
    %89 = vector.broadcast %cst_87 : f32 to vector<8x1xf32>
    %90 = arith.mulf %85, %89 : vector<8x1xf32>
    %cst_88 = arith.constant 0.001953125 : f32
    %91 = vector.broadcast %cst_88 : f32 to vector<8x1xf32>
    %92 = arith.mulf %88, %91 : vector<8x1xf32>
    %93 = arith.mulf %90, %90 : vector<8x1xf32>
    %94 = arith.subf %92, %93 : vector<8x1xf32>
    %cst_89 = arith.constant 0.000000e+00 : f32
    %95 = vector.broadcast %cst_89 : f32 to vector<8x1xf32>
    %96 = arith.maximumf %94, %95 : vector<8x1xf32>
    %cst_90 = arith.constant 9.99999974E-6 : f32
    %97 = vector.broadcast %cst_90 : f32 to vector<8x1xf32>
    %98 = arith.addf %96, %97 : vector<8x1xf32>
    %99 = math.rsqrt %98 : vector<8x1xf32>
    %100 = arith.mulf %80, %99 : vector<8x1xf32>
    %101 = arith.mulf %90, %100 : vector<8x1xf32>
    %102 = arith.subf %81, %101 : vector<8x1xf32>
    %103 = vector.broadcast %100 : vector<8x1xf32> to vector<8x648xf32>
    %104 = arith.mulf %79, %103 : vector<8x648xf32>
    %105 = vector.broadcast %102 : vector<8x1xf32> to vector<8x648xf32>
    %106 = arith.addf %104, %105 : vector<8x648xf32>
    %cst_91 = arith.constant 0.000000e+00 : f32
    %107 = vector.broadcast %cst_91 : f32 to vector<8x648xf32>
    %108 = arith.maximumf %106, %107 : vector<8x648xf32>
    %c0_92 = arith.constant 0 : index
    %c0_93 = arith.constant 0 : index
    %109 = vector.load %arg8[%c0_92, %c0_93] : memref<8x648xf32, #tpu.memory_space<vmem>>, vector<8x648xf32>
    tpu.vector_store %arg8[%c0_92, %c0_93], %108 {strides = array<i32>} : memref<8x648xf32, #tpu.memory_space<vmem>>, vector<8x648xf32>,
    return
  }
}

</mosaic_0001>

<bundles_post_ra>
// kernel: conv_block_pallas.1
= control target key start
LH: loop header
LB: loop body
LE: loop exit
PB: predicated region body
PF: predicated region fallthrough
CT: control target
= control target key end

     0   :  { %v74_v0 = vlaneseq  ;;  %v1579_v1 = vmov 1983009808   ;;  %s1580_s29 = smov 126   ;;  %s1581_s30 = smov 127   ;;  %vm62_vm0 = vcmask 1041408   ;;  %vm63_vm1 = vcmask 62468   ;;  %s2070_s0 = inlined_call_operand.vmem [shape: bf16[4,686], index: 0, kind: input, shape index: {}]   ;;  %s2071_s2 = inlined_call_operand.vmem [shape: bf16[8,36], index: 2, kind: input, shape index: {}]   ;;  %s2072_s1 = inlined_call_operand.vmem [shape: f32[1,648], index: 1, kind: input, shape index: {}]   ;;  %s2073_s3 = inlined_call_operand.vmem [shape: f32[8,1], index: 3, kind: input, shape index: {}]   ;;  %s2074_s4 = inlined_call_operand.vmem [shape: f32[8,1], index: 4, kind: input, shape index: {}]   ;;  %s2075_s5 = inlined_call_operand.vmem [shape: bf16[8,72], index: 5, kind: input, shape index: {}]   ;;  %s2076_s6 = inlined_call_operand.vmem [shape: f32[8,1], index: 6, kind: input, shape index: {}]   ;;  %s2077_s7 = inlined_call_operand.vmem [shape: f32[8,1], index: 7, kind: input, shape index: {}]   ;;  %s2078_s8 = inlined_call_operand.vmem [shape: f32[8,648], index: 8, kind: output, shape index: {}]  }
   0x1   :  { %v72_v2 = vunpack.c.l.s4 %v1579_v1  ;;  %v118_v3 = vld [vmem:[%s2070_s0] sm:$0xff]  ;;  %s1582_s9 = smov 110   ;;  %s1583_s10 = smov 109   ;;  %vm1655_vm2 = vmor %vm63_vm1, %vm62_vm0  ;;  %v1534_v14 = vld [vmem:[%s2070_s0 + $0x8] ss:$0 sps:$4 sm:$0xff]   ;;  %v1588_v22 = vmov 0  }
   0x2   :  { %v1638_v4 = vshrl.u32 %v74_v0, 7  ;;  %v122_v5 = vcombine.high %v118_v3, %v118_v3  ;;  %1447 = vst.sshfl [vmem:[#allocation3] sm:$0xf pattern:$0x76325410] %v118_v3  ;;  %v70_v7 = vcombine.low %v118_v3, %v118_v3  ;;  %s1584_s11 = smov 108   ;;  %595 = vmatprep.mubr.bf16.mxu0 %v1588_v22  ;;  %636 = vmatprep.mubr.bf16.mxu1 %v1588_v22 }
   0x3   :  { %v73_v6 = vunpack.c.0.s8 %v72_v2  ;;  %v1449_v12 = vld.sshfl [vmem:[%s2070_s0 + $0x8] sm:$0x33 pattern:$0x76325410]  ;;  %s1585_s14 = smov 92   ;;  %s1586_s17 = smov 91   ;;  %1530 = vset.pattern.permute.xlu0 %v1588_v22  ;;  %1531 = vset.pattern.permute.xlu1 %v1588_v22 }
   0x4   :  { %1448 = vst.sshfl [vmem:[#allocation3 + $0x8] sm:$0xf pattern:$0x76325410] %v122_v5  ;;  %65 = vst.msk [vmem:[#allocation3 + $0x10] sm:$0x33] %vm1655_vm2, %v1449_v12 }
   0x5   :  { %v76_v8 = vsub.s32 %v73_v6, %v1638_v4  ;;  %v1535_v16 = vld [vmem:[%s2070_s0 + $0x8] ss:$0 sps:$4 sm:$0xff]   ;;  %s1587_s20 = smov 90   ;;  %vm102_vm3 = vcmask 1043456   ;;  %vm154_vm4 = vcmask 1031168   ;;  %vm104_vm5 = vcmask 1039360  }
   0x6   :  { %v1536_v18 = vld [vmem:[%s2070_s0 + $0x8] ss:$0 sps:$4 sm:$0xff]   ;;  %vm202_vm6 = vcmask 900096   ;;  %vm249_vm7 = vcmask 891904   ;;  %vm297_vm8 = vcmask 883712   ;;  %vm344_vm9 = vcmask 752640  }
   0x7   :  { %v129_v9 = vrot.slane %v118_v3, %v76_v8  ;;  %v77_v10 = vrot.slane %v70_v7, %v76_v8  ;;  %v136_v11 = vrot.slane %v122_v5, %v76_v8  ;;  %v92_v15 = vrot.slane %v1534_v14, %v76_v8  ;;  %v1537_v20 = vld [vmem:[%s2070_s0 + $0x8] ss:$0 sps:$4 sm:$0xff]   ;;  %v450_v13 = vld [vmem:[%s2071_s2] sm:$0xf] }
   0x8   :  { %v191_v17 = vrot.slane %v1535_v16, %v76_v8  ;;  %v286_v19 = vrot.slane %v1536_v18, %v76_v8  ;;  %v381_v21 = vrot.slane %v1537_v20, %v76_v8  ;;  %vm392_vm10 = vcmask 744448  }
   0x9   :  { %144 = vrot.lane.b32.xlu1 %v129_v9, %s1580_s29  ;;  %93 = vrot.lane.b32.xlu0 %v77_v10, %s1581_s30  ;;  %vm114_vm11 = vcmask 1043458   ;;  %vm115_vm12 = vcmask 64518   ;;  %vm439_vm14 = vcmask 736256   ;;  %vm541_vm15 = vcmask 293888  }
   0xa   :  { %vm1736_vm13 = vmor %vm115_vm12, %vm114_vm11  ;;  %vm786_vm1 = vcmask 150528   ;;  %vm834_vm11 = vcmask 1047556   ;;  %vm824_vm12 = vcmask 154624  }
   0xb   :  { %787 = vst.msk [vmem:[#allocation2] sm:$0xf] %vm786_vm1, %v1588_v22 }
   0xd   :  { %146 = vrot.lane.b32.xlu1 %v136_v11, %s1580_s29  ;;  %95 = vrot.lane.b32.xlu0 %v129_v9, %s1581_s30 }
  0x11   :  { %194 = vrot.lane.b32.xlu1 %v129_v9, %s1582_s9  ;;  %192 = vrot.lane.b32.xlu0 %v77_v10, %s1582_s9 }
  0x15   :  { %241 = vrot.lane.b32.xlu1 %v136_v11, %s1583_s10  ;;  %239 = vrot.lane.b32.xlu0 %v129_v9, %s1583_s10 }
  0x19   :  { %289 = vrot.lane.b32.xlu1 %v129_v9, %s1584_s11  ;;  %287 = vrot.lane.b32.xlu0 %v77_v10, %s1584_s11 }
  0x1d   :  { %336 = vrot.lane.b32.xlu1 %v136_v11, %s1585_s14  ;;  %334 = vrot.lane.b32.xlu0 %v129_v9, %s1585_s14 }
  0x21   :  { %384 = vrot.lane.b32.xlu1 %v129_v9, %s1586_s17  ;;  %382 = vrot.lane.b32.xlu0 %v77_v10, %s1586_s17 }
  0x25   :  { %148 = vrot.lane.b32.xlu1 %v1449_v12, %s1580_s29  ;;  %97 = vrot.lane.b32.xlu0 %v92_v15, %s1581_s30 }
  0x29   :  { %429 = vrot.lane.b32.xlu1 %v129_v9, %s1587_s20  ;;  %196 = vrot.lane.b32.xlu0 %v191_v17, %s1582_s9 }
  0x2d   :  { %243 = vrot.lane.b32.xlu1 %v1449_v12, %s1583_s10  ;;  %431 = vrot.lane.b32.xlu0 %v136_v11, %s1587_s20 }
  0x31   :  { %338 = vrot.lane.b32.xlu1 %v1449_v12, %s1585_s14  ;;  %291 = vrot.lane.b32.xlu0 %v286_v19, %s1584_s11 }
  0x35   :  { %433 = vrot.lane.b32.xlu1 %v1449_v12, %s1587_s20  ;;  %386 = vrot.lane.b32.xlu0 %v381_v21, %s1586_s17 }
  0x7b   :  { %v145_v23 = vpop.permute.xlu1 %144  ;;  %v94_v24 = vpop.permute.xlu0 %93 }
  0x7c   :  { %v150_v25 = vrot.slane %v145_v23, 4  ;;  %v99_v28 = vrot.slane %v94_v24, 4 }
  0x7f   :  { %v1691_v26 = vpop.permute.xlu1 %146  ;;  %v1693_v27 = vpop.permute.xlu0 %95 }
  0x80   :  { %v151_v29 = vrot.slane %v1691_v26, 4  ;;  %v100_v30 = vrot.slane %v1693_v27, 4 }
  0x82   :  { %v153_v31 = vsel %vm102_vm3, %v150_v25, %v151_v29  ;;  %v103_v32 = vsel %vm102_vm3, %v99_v28, %v100_v30 }
  0x83   :  { %v155_v33 = vsel %vm154_vm4, %v145_v23, %v153_v31  ;;  %v105_v34 = vsel %vm104_vm5, %v94_v24, %v103_v32  ;;  %v1701_v35 = vpop.permute.xlu1 %194  ;;  %v193_v36 = vpop.permute.xlu0 %192 }
  0x84   :  { %162 = vst [vmem:[#allocation3 + $0x18] sm:$0x33] %v155_v33  ;;  %112 = vst [vmem:[#allocation3] sm:$0xcc] %v105_v34  ;;  %v199_v37 = vrot.slane %v1701_v35, 4  ;;  %v198_v38 = vrot.slane %v193_v36, 4 }
  0x86   :  { %v201_v39 = vsel %vm102_vm3, %v198_v38, %v199_v37 }
  0x87   :  { %v203_v40 = vsel %vm202_vm6, %v193_v36, %v201_v39  ;;  %v1708_v41 = vpop.permute.xlu1 %241  ;;  %v240_v42 = vpop.permute.xlu0 %239 }
  0x88   :  { %210 = vst [vmem:[#allocation3 + $0x18] sm:$0xcc] %v203_v40  ;;  %v246_v43 = vrot.slane %v1708_v41, 4  ;;  %v245_v44 = vrot.slane %v240_v42, 4 }
  0x8a   :  { %v248_v45 = vsel %vm102_vm3, %v245_v44, %v246_v43 }
  0x8b   :  { %v250_v46 = vsel %vm249_vm7, %v240_v42, %v248_v45  ;;  %v1715_v47 = vpop.permute.xlu1 %289  ;;  %v288_v48 = vpop.permute.xlu0 %287 }
  0x8c   :  { %257 = vst [vmem:[#allocation3 + $0x30] sm:$0x33] %v250_v46  ;;  %v294_v49 = vrot.slane %v1715_v47, 4  ;;  %v293_v50 = vrot.slane %v288_v48, 4 }
  0x8e   :  { %v296_v51 = vsel %vm102_vm3, %v293_v50, %v294_v49 }
  0x8f   :  { %v298_v52 = vsel %vm297_vm8, %v288_v48, %v296_v51  ;;  %v1722_v53 = vpop.permute.xlu1 %336  ;;  %v335_v54 = vpop.permute.xlu0 %334  ;;  %v1538_v55 = vld [vmem:[#allocation3 + $0x4] ss:$24 sps:$4 sm:$0xff]   ;;  %v1540_v56 = vld [vmem:[#allocation3] ss:$24 sps:$4 sm:$0xff]  }
  0x90   :  { %305 = vst [vmem:[#allocation3 + $0x30] sm:$0xcc] %v298_v52  ;;  %v341_v57 = vrot.slane %v1722_v53, 4  ;;  %v340_v58 = vrot.slane %v335_v54, 4  ;;  %563 = vmatprep.subr.bf16.mxu0 %v1538_v55 }
  0x91   :  { %564 = vmatpush1.bf16.msra.mxu0 %v1540_v56 }
  0x92   :  { %v343_v59 = vsel %vm102_vm3, %v340_v58, %v341_v57 }
  0x93   :  { %v345_v60 = vsel %vm344_vm9, %v335_v54, %v343_v59  ;;  %v1729_v61 = vpop.permute.xlu1 %384  ;;  %v383_v62 = vpop.permute.xlu0 %382 }
  0x94   :  { %352 = vst [vmem:[#allocation3 + $0x48] sm:$0x33] %v345_v60  ;;  %v389_v63 = vrot.slane %v1729_v61, 4  ;;  %v388_v0 = vrot.slane %v383_v62, 4 }
  0x96   :  { %v391_v1 = vsel %vm102_vm3, %v388_v0, %v389_v63 }
  0x97   :  { %v393_v2 = vsel %vm392_vm10, %v383_v62, %v391_v1  ;;  %v149_v3 = vpop.permute.xlu1 %148  ;;  %v98_v5 = vpop.permute.xlu0 %97 }
  0x98   :  { %400 = vst [vmem:[#allocation3 + $0x48] sm:$0xcc] %v393_v2  ;;  %v152_v6 = vrot.slane %v149_v3, 4  ;;  %v101_v8 = vrot.slane %v98_v5, 4 }
  0x9a   :  { %v156_v9 = vsel %vm102_vm3, %v151_v29, %v152_v6  ;;  %v158_v10 = vsel %vm154_vm4, %v149_v3, %v152_v6  ;;  %v106_v11 = vsel %vm102_vm3, %v100_v30, %v101_v8  ;;  %v108_v12 = vsel %vm104_vm5, %v98_v5, %v101_v8 }
  0x9b   :  { %v157_v14 = vsel %vm154_vm4, %v1691_v26, %v156_v9  ;;  %164 = vst.msk [vmem:[#allocation3 + $0x28] sm:$0x33] %vm1655_vm2, %v158_v10  ;;  %v107_v15 = vsel %vm104_vm5, %v1693_v27, %v106_v11  ;;  %v430_v16 = vpop.permute.xlu1 %429  ;;  %v197_v17 = vpop.permute.xlu0 %196  ;;  %v457_v26 = vld [vmem:[#allocation3 + $0x30] sm:$0xff] }
  0x9c   :  { %117 = vst.msk [vmem:[#allocation3 + $0x10] sm:$0xcc] %vm1736_vm13, %v108_v12  ;;  %163 = vst [vmem:[#allocation3 + $0x20] sm:$0x33] %v157_v14  ;;  %v200_v18 = vrot.slane %v197_v17, 4  ;;  %v435_v19 = vrot.slane %v430_v16, 4 }
  0x9d   :  { %113 = vst [vmem:[#allocation3 + $0x8] sm:$0xcc] %v107_v15  ;;  %v691_v15 = vsub.s32 0, %v1638_v4 }
  0x9e   :  { %v204_v20 = vsel %vm102_vm3, %v199_v37, %v200_v18  ;;  %v206_v21 = vsel %vm202_vm6, %v197_v17, %v200_v18  ;;  %v695_v17 = vsub.s32 1, %v1638_v4 }
  0x9f   :  { %v205_v23 = vsel %vm202_vm6, %v1701_v35, %v204_v20  ;;  %212 = vst.msk [vmem:[#allocation3 + $0x28] sm:$0xcc] %vm1736_vm13, %v206_v21  ;;  %v244_v24 = vpop.permute.xlu1 %243  ;;  %v432_v25 = vpop.permute.xlu0 %431  ;;  %v460_v27 = vld [vmem:[#allocation3 + $0x48] sm:$0xff] }
  0xa0   :  { %v1541_v28 = vld [vmem:[#allocation3 + $0x34] ss:$24 sps:$4 sm:$0xff]   ;;  %211 = vst [vmem:[#allocation3 + $0x20] sm:$0xcc] %v205_v23  ;;  %v247_v29 = vrot.slane %v244_v24, 4  ;;  %v436_v30 = vrot.slane %v432_v25, 4  ;;  %v1459_v31 = vcombine.low %v457_v26, %v460_v27 }
  0xa1   :  { %565 = vmatprep.subr.bf16.mxu0 %v1541_v28 }
  0xa2   :  { %v251_v32 = vsel %vm102_vm3, %v246_v43, %v247_v29  ;;  %v253_v33 = vsel %vm249_vm7, %v244_v24, %v247_v29  ;;  %v438_v34 = vsel %vm102_vm3, %v435_v19, %v436_v30  ;;  %566 = vmatpush1.bf16.msra.mxu0 %v1459_v31  ;;  %v703_v31 = vsub.s32 3, %v1638_v4 }
  0xa3   :  { %v252_v35 = vsel %vm249_vm7, %v1708_v41, %v251_v32  ;;  %259 = vst.msk [vmem:[#allocation3 + $0x40] sm:$0x33] %vm1655_vm2, %v253_v33  ;;  %v440_v36 = vsel %vm439_vm14, %v430_v16, %v438_v34  ;;  %v339_v37 = vpop.permute.xlu1 %338  ;;  %v292_v38 = vpop.permute.xlu0 %291  ;;  %v30_v16 = vld [vmem:[%s2072_s1] sm:$0x3f]  ;;  %v707_v33 = vsub.s32 4, %v1638_v4  ;;  %v711_v34 = vsub.s32 5, %v1638_v4 }
  0xa4   :  { %258 = vst [vmem:[#allocation3 + $0x38] sm:$0x33] %v252_v35  ;;  %447 = vst [vmem:[#allocation3 + $0x60] sm:$0x33] %v440_v36  ;;  %v342_v39 = vrot.slane %v339_v37, 4  ;;  %v295_v40 = vrot.slane %v292_v38, 4  ;;  %v1819_v18 = vrot.slane %v30_v16, %v691_v15  ;;  %v1821_v19 = vrot.slane %v30_v16, %v695_v17 }
  0xa5   :  { %v1839_v36 = vrot.slane %v30_v16, %v703_v31 }
  0xa6   :  { %v346_v42 = vsel %vm102_vm3, %v341_v57, %v342_v39  ;;  %v348_v43 = vsel %vm344_vm9, %v339_v37, %v342_v39  ;;  %v299_v41 = vsel %vm102_vm3, %v294_v49, %v295_v40  ;;  %v301_v44 = vsel %vm297_vm8, %v292_v38, %v295_v40  ;;  %v1550_v0 = vld [vmem:[#allocation3 + $0x14] ss:$24 sps:$4 sm:$0xff]  }
  0xa7   :  { %v347_v45 = vsel %vm344_vm9, %v1722_v53, %v346_v42  ;;  %354 = vst.msk [vmem:[#allocation3 + $0x58] sm:$0x33] %vm1655_vm2, %v348_v43  ;;  %v300_v46 = vsel %vm297_vm8, %v1715_v47, %v299_v41  ;;  %v434_v48 = vpop.permute.xlu1 %433  ;;  %v387_v50 = vpop.permute.xlu0 %386  ;;  %v1543_v51 = vld [vmem:[#allocation3 + $0xc] ss:$24 sps:$4 sm:$0xff]   ;;  %v1545_v52 = vld [vmem:[#allocation3 + $0x8] ss:$24 sps:$4 sm:$0xff]   ;;  %v1841_v37 = vrot.slane %v30_v16, %v707_v33  ;;  %v1843_v38 = vrot.slane %v30_v16, %v711_v34 }
  0xa8   :  { %307 = vst.msk [vmem:[#allocation3 + $0x40] sm:$0xcc] %vm1736_vm13, %v301_v44  ;;  %353 = vst [vmem:[#allocation3 + $0x50] sm:$0x33] %v347_v45  ;;  %v437_v49 = vrot.slane %v434_v48, 4  ;;  %v390_v54 = vrot.slane %v387_v50, 4  ;;  %604 = vmatprep.subr.bf16.mxu1 %v1543_v51 }
  0xa9   :  { %306 = vst [vmem:[#allocation3 + $0x38] sm:$0xcc] %v300_v46  ;;  %605 = vmatpush1.bf16.msra.mxu1 %v1545_v52 }
  0xaa   :  { %v441_v53 = vsel %vm102_vm3, %v436_v30, %v437_v49  ;;  %v443_v55 = vsel %vm439_vm14, %v434_v48, %v437_v49  ;;  %v394_v47 = vsel %vm102_vm3, %v389_v63, %v390_v54  ;;  %v396_v56 = vsel %vm392_vm10, %v387_v50, %v390_v54 }
  0xab   :  { %v442_v57 = vsel %vm439_vm14, %v432_v25, %v441_v53  ;;  %449 = vst.msk [vmem:[#allocation3 + $0x70] sm:$0x33] %vm1655_vm2, %v443_v55  ;;  %v395_v58 = vsel %vm392_vm10, %v1729_v61, %v394_v47  ;;  %v463_v59 = vld [vmem:[#allocation3 + $0x60] sm:$0x33]  ;;  %v1548_v61 = vld [vmem:[#allocation3 + $0x10] ss:$24 sps:$4 sm:$0xff]  }
  0xac   :  { %402 = vst.msk [vmem:[#allocation3 + $0x58] sm:$0xcc] %vm1736_vm13, %v396_v56  ;;  %448 = vst [vmem:[#allocation3 + $0x68] sm:$0x33] %v442_v57  ;;  %v1466_v60 = vcombine.high %v463_v59, %v463_v59  ;;  %v1465_v62 = vcombine.low %v463_v59, %v463_v59  ;;  %v699_v30 = vsub.s32 2, %v1638_v4  ;;  %vm833_vm2 = vcmask 1043608  }
  0xad   :  { %401 = vst [vmem:[#allocation3 + $0x50] sm:$0xcc] %v395_v58  ;;  %vm835_vm13 = vmor %vm834_vm11, %vm833_vm2  ;;  %vm842_vm2 = vcmask 371928   ;;  %vm849_vm11 = vcmask 64516  }
  0xae   :  { %1471 = vmatprep.subr.msk.bf16.mxu0 %vm62_vm0, %v1466_v60  ;;  %v546_v63 = vsel %vm62_vm0, %v1465_v62, 0  ;;  %v1837_v35 = vrot.slane %v30_v16, %v699_v30 }
  0xaf   :  { %568 = vmatpush1.bf16.msra.mxu0 %v546_v63 }
  0xb0   :  { %645 = vmatprep.subr.bf16.mxu0 %v1550_v0 }
  0xb2   :  { %1472 = vmatmul.mubr.msk.bf16.vlgmr.msra.gmra.mrb[0].mxu0 %vm541_vm15, %v450_v13  ;;  %v465_v6 = vld [vmem:[#allocation3 + $0x70] sm:$0x33] }
  0xb3   :  { %v1553_v1 = vld [vmem:[#allocation3 + $0x44] ss:$24 sps:$4 sm:$0xff]   ;;  %646 = vmatpush1.bf16.msra.mxu0 %v1548_v61  ;;  %677 = vmatprep.mubr.bf16.mxu0 %v1588_v22  ;;  %v464_v5 = vld [vmem:[#allocation3 + $0x68] sm:$0x33]  ;;  %v1551_v7 = vld [vmem:[#allocation3 + $0x40] ss:$24 sps:$4 sm:$0xff]   ;;  %v1470_v10 = vcombine.high %v465_v6, %v465_v6  ;;  %v1469_v11 = vcombine.low %v465_v6, %v465_v6 }
  0xb4   :  { %v1554_v2 = vld [vmem:[#allocation3 + $0x3c] ss:$24 sps:$4 sm:$0xff]   ;;  %v1556_v3 = vld [vmem:[#allocation3 + $0x38] ss:$24 sps:$4 sm:$0xff]   ;;  %647 = vmatprep.subr.bf16.mxu0 %v1553_v1  ;;  %v1468_v8 = vcombine.high %v464_v5, %v464_v5  ;;  %v1467_v9 = vcombine.low %v464_v5, %v464_v5 }
  0xb5   :  { %606 = vmatprep.subr.bf16.mxu1 %v1554_v2  ;;  %v558_v14 = vsel %vm62_vm0, %v1469_v11, 0  ;;  %v687_v11 = vld [vmem:[%s2074_s4] sm:$0xff] }
  0xb6   :  { %607 = vmatpush1.bf16.msra.mxu1 %v1556_v3  ;;  %v552_v12 = vsel %vm62_vm0, %v1467_v9, 0 }
  0xb7   :  { %648 = vmatpush1.bf16.msra.mxu0 %v1551_v7  ;;  %1473 = vmatprep.subr.msk.bf16.mxu1 %vm62_vm0, %v1468_v8  ;;  %v686_v8 = vld [vmem:[%s2073_s3] sm:$0xff]  ;;  %s1589_s3 = smov 19  }
  0xb8   :  { %1475 = vmatprep.subr.msk.bf16.mxu0 %vm62_vm0, %v1470_v10  ;;  %vm729_vm0 = vcmask 64512  }
  0xba   :  { %609 = vmatpush1.bf16.msra.mxu1 %v552_v12 }
  0xbb   :  { %650 = vmatpush1.bf16.msra.mxu0 %v558_v14 }
  0xbd   :  { %1474 = vmatmul.mubr.msk.bf16.vlgmr.msra.gmra.mrb[0].mxu1 %vm541_vm15, %v450_v13 }
  0xbe   :  { %1476 = vmatmul.mubr.msk.bf16.vlgmr.msra.gmra.mrb[4].mxu0 %vm541_vm15, %v450_v13  ;;  %1277 = vmatprep.mubr.bf16.mxu1 %v1588_v22  ;;  %vm839_vm15 = vcmask 220164  }
  0xbf   :  { %1318 = vmatprep.mubr.bf16.mxu0 %v1588_v22  ;;  %vm840_vm1 = vmor %vm839_vm15, %vm102_vm3 }
 0x185   :  { %v1823_v20 = vpop.f32.mrb[0].mxu0 }
 0x186   :  { %v719_v21 = vmul.f32 %v1819_v18, %v1823_v20  ;;  %v1827_v23 = vpop.f32.mrb[1].mxu0 }
 0x187   :  { %v720_v24 = vmul.f32 %v1821_v19, %v1827_v23  ;;  %v601_v25 = vpop.f32.mrb[2].mxu0 }
 0x188   :  { %v734_v26 = vmul.f32 %v719_v21, %v1823_v20  ;;  %v602_v27 = vpop.f32.mrb[3].mxu0 }
 0x189   :  { %v725_v28 = vadd.f32 %v720_v24, %v719_v21  ;;  %v735_v29 = vmul.f32 %v720_v24, %v1827_v23 }
 0x18b   :  { %v740_v32 = vadd.f32 %v735_v29, %v734_v26 }
 0x190   :  { %v638_v39 = vpop.f32.mrb[0].mxu1 }
 0x191   :  { %v721_v40 = vmul.f32 %v1837_v35, %v638_v39  ;;  %v640_v42 = vpop.f32.mrb[1].mxu1  ;;  %v679_v43 = vpop.f32.mrb[4].mxu0 }
 0x192   :  { %v722_v41 = vmul.f32 %v1839_v36, %v640_v42  ;;  %v642_v44 = vpop.f32.mrb[2].mxu1  ;;  %v681_v45 = vpop.f32.mrb[5].mxu0  ;;  %v723_v48 = vmul.f32 %v1841_v37, %v679_v43 }
 0x193   :  { %v726_v46 = vadd.f32 %v725_v28, %v721_v40  ;;  %v736_v4 = vmul.f32 %v721_v40, %v638_v39  ;;  %v724_v50 = vmul.f32 %v1843_v38, %v681_v45  ;;  %v643_v51 = vpop.f32.mrb[3].mxu1  ;;  %v683_v52 = vpop.f32.mrb[6].mxu0 }
 0x194   :  { %v737_v49 = vmul.f32 %v722_v41, %v640_v42  ;;  %v684_v54 = vpop.f32.mrb[7].mxu0  ;;  %v738_v57 = vmul.f32 %v723_v48, %v679_v43 }
 0x195   :  { %v741_v53 = vadd.f32 %v740_v32, %v736_v4  ;;  %v727_v55 = vadd.f32 %v726_v46, %v722_v41  ;;  %v739_v47 = vmul.f32 %v724_v50, %v681_v45  ;;  %v730_v56 = vsel %vm729_vm0, %v724_v50, 0.0 }
 0x197   :  { %v728_v58 = vadd.f32 %v727_v55, %v723_v48  ;;  %v742_v59 = vadd.f32 %v741_v53, %v737_v49  ;;  %v744_v63 = vsel %vm729_vm0, %v739_v47, 0.0 }
 0x199   :  { %v731_v60 = vadd.f32 %v730_v56, %v728_v58  ;;  %v743_v62 = vadd.f32 %v742_v59, %v738_v57 }
 0x19b   :  { %732 = vadd.xlane.f32.xlu0 %v731_v60  ;;  %v745_v0 = vadd.f32 %v744_v63, %v743_v62 }
 0x19d   :  { %746 = vadd.xlane.f32.xlu1 %v745_v0 }
 0x228   :  { %v733_v13 = vpop.xlane.xlu0 %732 }
 0x229   :  { %v748_v61 = vmul.f32 0.001953125, %v733_v13 }
 0x22a   :  { %v747_v1 = vpop.xlane.xlu1 %746 }
 0x22b   :  { %v750_v2 = vmul.f32 %v748_v61, %v748_v61  ;;  %v749_v3 = vmul.f32 0.001953125, %v747_v1 }
 0x22d   :  { %v751_v5 = vsub.f32 %v749_v3, %v750_v2 }
 0x22f   :  { %v752_v6 = vmax.f32 %v751_v5, 0.0 }
 0x231   :  { %v753_v7 = vadd.f32 1e-05, %v752_v6 }
 0x233   :  { %1575 = vrsqrt.f32 %v753_v7 }
 0x23d   :  { %v1576_v9 = vpop.eup %1575 }
 0x23e   :  { %v755_v10 = vmul.f32 %v1576_v9, %v686_v8 }
 0x240   :  { %760 = vperm.xlu0 %1530, %v755_v10   ;;  %v756_v12 = vmul.f32 %v755_v10, %v748_v61 }
 0x242   :  { %v757_v14 = vsub.f32 %v687_v11, %v756_v12 }
 0x244   :  { %771 = vperm.xlu1 %1531, %v757_v14  }
 0x2bf   :  { %v761_v15 = vpop.permute.xlu0 %760 }
 0x2c0   :  { %v763_v16 = vmul.f32 %v761_v15, %v1823_v20  ;;  %v764_v17 = vmul.f32 %v761_v15, %v1827_v23  ;;  %v765_v21 = vmul.f32 %v761_v15, %v638_v39  ;;  %v766_v24 = vmul.f32 %v761_v15, %v640_v42 }
 0x2c1   :  { %v767_v26 = vmul.f32 %v761_v15, %v679_v43  ;;  %v768_v27 = vmul.f32 %v761_v15, %v681_v45 }
 0x2c3   :  { %v772_v25 = vpop.permute.xlu1 %771 }
 0x2c4   :  { %v774_v28 = vadd.f32 %v772_v25, %v763_v16  ;;  %v775_v29 = vadd.f32 %v772_v25, %v764_v17  ;;  %v776_v30 = vadd.f32 %v772_v25, %v765_v21  ;;  %v777_v31 = vadd.f32 %v772_v25, %v766_v24 }
 0x2c5   :  { %v778_v32 = vadd.f32 %v772_v25, %v767_v26  ;;  %v779_v33 = vadd.f32 %v772_v25, %v768_v27 }
 0x2c6   :  { %v780_v34 = vmax.f32 %v774_v28, 0.0  ;;  %v781_v40 = vmax.f32 %v775_v29, 0.0  ;;  %v782_v41 = vmax.f32 %v776_v30, 0.0  ;;  %v783_v44 = vmax.f32 %v777_v31, 0.0 }
 0x2c7   :  { %v784_v46 = vmax.f32 %v778_v32, 0.0  ;;  %v785_v4 = vmax.f32 %v779_v33, 0.0 }
 0x2c8   :  { %v788_v20 = vmul.f32 %v780_v34, %v1819_v18  ;;  %v789_v23 = vmul.f32 %v781_v40, %v1821_v19  ;;  %v790_v39 = vmul.f32 %v782_v41, %v1837_v35  ;;  %v791_v42 = vmul.f32 %v783_v44, %v1839_v36 }
 0x2c9   :  { %v792_v43 = vmul.f32 %v784_v46, %v1841_v37  ;;  %v793_v45 = vmul.f32 %v785_v4, %v1843_v38 }
 0x2ca   :  { %v1516_v48 = vpack.c.bf16 %v789_v23, %v788_v20  ;;  %v1517_v50 = vpack.c.bf16 %v791_v42, %v790_v39 }
 0x2cb   :  { %v1518_v51 = vpack.c.bf16 %v793_v45, %v792_v43 }
 0x2cc   :  { %815 = vrot.lane.b32.xlu1 %v1516_v48, %s1589_s3 }
 0x2d0   :  { %817 = vrot.lane.b32.xlu1 %v1517_v50, %s1589_s3 }
 0x2d4   :  { %819 = vrot.lane.b32.xlu1 %v1518_v51, %s1589_s3 }
 0x33e   :  { %v816_v52 = vpop.permute.xlu1 %815 }
 0x33f   :  { %v821_v49 = vrot.slane %v816_v52, 4 }
 0x341   :  { %v825_v54 = vsel %vm824_vm12, %v821_v49, %v816_v52 }
 0x342   :  { %836 = vst.msk [vmem:[#allocation2] sm:$0xff] %vm835_vm13, %v825_v54  ;;  %v818_v53 = vpop.permute.xlu1 %817  ;;  %vm1888_vm13 = vmor %vm849_vm11, %vm102_vm3 }
 0x343   :  { %v822_v55 = vrot.slane %v818_v53, 4 }
 0x345   :  { %v826_v47 = vsel %vm102_vm3, %v821_v49, %v822_v55 }
 0x346   :  { %v1869_v56 = vsel %vm824_vm12, %v826_v47, %v818_v53  ;;  %v820_v57 = vpop.permute.xlu1 %819 }
 0x347   :  { %v823_v58 = vrot.slane %v820_v57, 4  ;;  %886 = vrot.lane.b32.xlu0 %v1869_v56, %s1580_s29 }
 0x349   :  { %v1874_v59 = vld [vmem:[#allocation2] sm:$0xff]  ;;  %v828_v60 = vsel %vm102_vm3, %v822_v55, %v823_v58 }
 0x34a   :  { %v829_v62 = vsel %vm824_vm12, %v828_v60, %v820_v57  ;;  %858 = vrot.lane.b32.xlu1 %v1874_v59, %s1581_s30 }
 0x34b   :  { %841 = vst.msk [vmem:[#allocation2 + $0x10] sm:$0xff] %vm840_vm1, %v829_v62  ;;  %912 = vrot.lane.b32.xlu0 %v1869_v56, %s1582_s9 }
 0x34c   :  { %843 = vst.msk [vmem:[#allocation2 + $0x14] sm:$0xf] %vm842_vm2, %v1588_v22 }
 0x34e   :  { %884 = vrot.lane.b32.xlu1 %v1874_v59, %s1580_s29 }
 0x34f   :  { %938 = vrot.lane.b32.xlu0 %v1869_v56, %s1583_s10 }
 0x352   :  { %910 = vrot.lane.b32.xlu1 %v1874_v59, %s1582_s9 }
 0x353   :  { %v846_v0 = vld [vmem:[#allocation2 + $0x10] sm:$0xff]  ;;  %964 = vrot.lane.b32.xlu0 %v1869_v56, %s1584_s11 }
 0x354   :  { %851 = vst.msk [vmem:[#allocation4 + $0x10] sm:$0xff] %vm1888_vm13, %v846_v0 }
 0x356   :  { %936 = vrot.lane.b32.xlu1 %v1874_v59, %s1583_s10 }
 0x357   :  { %990 = vrot.lane.b32.xlu0 %v1869_v56, %s1585_s14 }
 0x35a   :  { %962 = vrot.lane.b32.xlu1 %v1874_v59, %s1584_s11 }
 0x35b   :  { %1016 = vrot.lane.b32.xlu0 %v1869_v56, %s1586_s17 }
 0x35e   :  { %860 = vrot.lane.b32.xlu1 %v1869_v56, %s1581_s30 }
 0x35f   :  { %1040 = vrot.lane.b32.xlu0 %v1874_v59, %s1587_s20 }
 0x362   :  { %988 = vrot.lane.b32.xlu1 %v1874_v59, %s1585_s14 }
 0x363   :  { %888 = vrot.lane.b32.xlu0 %v846_v0, %s1580_s29 }
 0x366   :  { %1014 = vrot.lane.b32.xlu1 %v1874_v59, %s1586_s17 }
 0x367   :  { %940 = vrot.lane.b32.xlu0 %v846_v0, %s1583_s10 }
 0x36a   :  { %1042 = vrot.lane.b32.xlu1 %v1869_v56, %s1587_s20 }
 0x36b   :  { %992 = vrot.lane.b32.xlu0 %v846_v0, %s1585_s14 }
 0x36e   :  { %862 = vrot.lane.b32.xlu1 %v846_v0, %s1581_s30 }
 0x36f   :  { %1044 = vrot.lane.b32.xlu0 %v846_v0, %s1587_s20 }
 0x372   :  { %914 = vrot.lane.b32.xlu1 %v846_v0, %s1582_s9 }
 0x376   :  { %966 = vrot.lane.b32.xlu1 %v846_v0, %s1584_s11 }
 0x37a   :  { %1018 = vrot.lane.b32.xlu1 %v846_v0, %s1586_s17 }
 0x3b9   :  { %v887_v13 = vpop.permute.xlu0 %886 }
 0x3ba   :  { %v891_v5 = vrot.slane %v887_v13, 4 }
 0x3bc   :  { %v859_v61 = vpop.permute.xlu1 %858 }
 0x3bd   :  { %v1924_v1 = vpop.permute.xlu0 %912  ;;  %v864_v34 = vrot.slane %v859_v61, 4 }
 0x3be   :  { %v917_v11 = vrot.slane %v1924_v1, 4 }
 0x3c0   :  { %v885_v2 = vpop.permute.xlu1 %884 }
 0x3c1   :  { %v890_v3 = vrot.slane %v885_v2, 4  ;;  %v939_v6 = vpop.permute.xlu0 %938 }
 0x3c2   :  { %v943_v21 = vrot.slane %v939_v6, 4 }
 0x3c3   :  { %v893_v7 = vsel %vm102_vm3, %v890_v3, %v891_v5 }
 0x3c4   :  { %v894_v8 = vsel %vm154_vm4, %v885_v2, %v893_v7  ;;  %v911_v9 = vpop.permute.xlu1 %910 }
 0x3c5   :  { %v916_v10 = vrot.slane %v911_v9, 4  ;;  %v1929_v12 = vpop.permute.xlu0 %964 }
 0x3c6   :  { %v969_v29 = vrot.slane %v1929_v12, 4 }
 0x3c7   :  { %v919_v14 = vsel %vm102_vm3, %v916_v10, %v917_v11 }
 0x3c8   :  { %v920_v15 = vsel %vm202_vm6, %v911_v9, %v919_v14  ;;  %v937_v16 = vpop.permute.xlu1 %936 }
 0x3c9   :  { %v942_v17 = vrot.slane %v937_v16, 4  ;;  %v991_v24 = vpop.permute.xlu0 %990  ;;  %v1487_v50 = vcombine.high %v894_v8, %v920_v15 }
 0x3ca   :  { %v995_v20 = vrot.slane %v991_v24, 4 }
 0x3cb   :  { %v945_v25 = vsel %vm102_vm3, %v942_v17, %v943_v21 }
 0x3cc   :  { %v946_v26 = vsel %vm249_vm7, %v937_v16, %v945_v25  ;;  %v963_v27 = vpop.permute.xlu1 %962 }
 0x3cd   :  { %v968_v28 = vrot.slane %v963_v27, 4  ;;  %v1938_v30 = vpop.permute.xlu0 %1016 }
 0x3ce   :  { %v1021_v53 = vrot.slane %v1938_v30, 4 }
 0x3cf   :  { %v971_v31 = vsel %vm102_vm3, %v968_v28, %v969_v29 }
 0x3d0   :  { %v972_v32 = vsel %vm297_vm8, %v963_v27, %v971_v31  ;;  %v1944_v33 = vpop.permute.xlu1 %860 }
 0x3d1   :  { %v865_v40 = vrot.slane %v1944_v33, 4  ;;  %v1041_v41 = vpop.permute.xlu0 %1040  ;;  %v1493_v62 = vcombine.high %v946_v26, %v972_v32  ;;  %v1492_v10 = vcombine.low %v946_v26, %v972_v32 }
 0x3d2   :  { %v1046_v3 = vrot.slane %v1041_v41, 4 }
 0x3d3   :  { %v867_v44 = vsel %vm102_vm3, %v864_v34, %v865_v40 }
 0x3d4   :  { %v868_v46 = vsel %vm104_vm5, %v859_v61, %v867_v44  ;;  %v989_v4 = vpop.permute.xlu1 %988 }
 0x3d5   :  { %v994_v23 = vrot.slane %v989_v4, 4  ;;  %v889_v39 = vpop.permute.xlu0 %888  ;;  %v1480_v42 = vcombine.low %v1874_v59, %v868_v46  ;;  %v1481_v43 = vcombine.high %v1874_v59, %v868_v46  ;;  %v1486_v59 = vcombine.low %v894_v8, %v920_v15 }
 0x3d6   :  { %v892_v45 = vrot.slane %v889_v39, 4 }
 0x3d7   :  { %v997_v48 = vsel %vm102_vm3, %v994_v23, %v995_v20  ;;  %1245 = vmatprep.subr.bf16.mxu1 %v1481_v43 }
 0x3d8   :  { %v998_v51 = vsel %vm344_vm9, %v989_v4, %v997_v48  ;;  %v1015_v52 = vpop.permute.xlu1 %1014  ;;  %v895_v49 = vsel %vm102_vm3, %v891_v5, %v892_v45  ;;  %v897_v54 = vsel %vm154_vm4, %v889_v39, %v892_v45  ;;  %1246 = vmatpush1.bf16.msra.mxu1 %v1480_v42 }
 0x3d9   :  { %v1020_v55 = vrot.slane %v1015_v52, 4  ;;  %v1957_v47 = vsel %vm154_vm4, %v887_v13, %v895_v49  ;;  %903 = vst.msk [vmem:[#allocation4 + $0x40] sm:$0xff] %vm1888_vm13, %v897_v54  ;;  %v941_v57 = vpop.permute.xlu0 %940  ;;  %1247 = vmatprep.subr.bf16.mxu1 %v1487_v50  ;;  %vm1223_vm4 = vcmask 588800  }
 0x3da   :  { %v944_v58 = vrot.slane %v941_v57, 4 }
 0x3db   :  { %v1023_v60 = vsel %vm102_vm3, %v1020_v55, %v1021_v53 }
 0x3dc   :  { %v1024_v0 = vsel %vm392_vm10, %v1015_v52, %v1023_v60  ;;  %v1043_v61 = vpop.permute.xlu1 %1042  ;;  %v947_v2 = vsel %vm102_vm3, %v943_v21, %v944_v58  ;;  %v949_v13 = vsel %vm249_vm7, %v941_v57, %v944_v58  ;;  %1248 = vmatpush1.bf16.msra.mxu1 %v1486_v59 }
 0x3dd   :  { %v1047_v5 = vrot.slane %v1043_v61, 4  ;;  %v1968_v7 = vsel %vm249_vm7, %v939_v6, %v947_v2  ;;  %955 = vst.msk [vmem:[#allocation4 + $0x70] sm:$0xff] %vm1888_vm13, %v949_v13  ;;  %v993_v8 = vpop.permute.xlu0 %992  ;;  %1249 = vmatprep.subr.bf16.mxu1 %v1493_v62  ;;  %v1499_v15 = vcombine.high %v998_v51, %v1024_v0  ;;  %v1498_v31 = vcombine.low %v998_v51, %v1024_v0 }
 0x3de   :  { %v996_v9 = vrot.slane %v993_v8, 4 }
 0x3df   :  { %v1049_v14 = vsel %vm102_vm3, %v1046_v3, %v1047_v5 }
 0x3e0   :  { %v1050_v16 = vsel %vm439_vm14, %v1041_v41, %v1049_v14  ;;  %v863_v17 = vpop.permute.xlu1 %862  ;;  %v999_v21 = vsel %vm102_vm3, %v995_v20, %v996_v9  ;;  %v1001_v25 = vsel %vm344_vm9, %v993_v8, %v996_v9  ;;  %1250 = vmatpush1.bf16.msra.mxu1 %v1492_v10 }
 0x3e1   :  { %v866_v6 = vrot.slane %v863_v17, 4  ;;  %v1977_v27 = vsel %vm344_vm9, %v991_v24, %v999_v21  ;;  %1007 = vst.msk [vmem:[#allocation4 + $0xa0] sm:$0xff] %vm1888_vm13, %v1001_v25  ;;  %v1045_v28 = vpop.permute.xlu0 %1044  ;;  %1251 = vmatprep.subr.bf16.mxu1 %v1499_v15  ;;  %v1505_v41 = vcombine.high %v1050_v16, %v1050_v16  ;;  %v1504_v44 = vcombine.low %v1050_v16, %v1050_v16 }
 0x3e2   :  { %v1048_v26 = vrot.slane %v1045_v28, 4 }
 0x3e3   :  { %v869_v32 = vsel %vm102_vm3, %v865_v40, %v866_v6  ;;  %v871_v34 = vsel %vm104_vm5, %v863_v17, %v866_v6  ;;  %v1228_v45 = vsel %vm102_vm3, %v1504_v44, 0 }
 0x3e4   :  { %v870_v46 = vsel %vm104_vm5, %v1944_v33, %v869_v32  ;;  %877 = vst.msk [vmem:[#allocation4 + $0x28] sm:$0xff] %vm1888_vm13, %v871_v34  ;;  %v915_v24 = vpop.permute.xlu1 %914  ;;  %v1051_v4 = vsel %vm102_vm3, %v1047_v5, %v1048_v26  ;;  %v1053_v20 = vsel %vm439_vm14, %v1045_v28, %v1048_v26  ;;  %1252 = vmatpush1.bf16.msra.mxu1 %v1498_v31 }
 0x3e5   :  { %v918_v23 = vrot.slane %v915_v24, 4  ;;  %v1052_v39 = vsel %vm439_vm14, %v1043_v61, %v1051_v4  ;;  %1059 = vst.msk [vmem:[#allocation4 + $0xd0] sm:$0xff] %vm1888_vm13, %v1053_v20  ;;  %1510 = vmatprep.subr.msk.bf16.mxu1 %vm102_vm3, %v1505_v41  ;;  %v1482_v40 = vcombine.low %v1869_v56, %v870_v46  ;;  %v1483_v33 = vcombine.high %v1869_v56, %v870_v46  ;;  %v1060_v56 = vld [vmem:[%s2075_s5] sm:$0xf] }
 0x3e6   :  { %v1507_v3 = vcombine.high %v1052_v39, %v1052_v39  ;;  %v1506_v5 = vcombine.low %v1052_v39, %v1052_v39 }
 0x3e7   :  { %v921_v42 = vsel %vm102_vm3, %v917_v11, %v918_v23  ;;  %v923_v43 = vsel %vm202_vm6, %v915_v24, %v918_v23  ;;  %1286 = vmatprep.subr.bf16.mxu0 %v1483_v33 }
 0x3e8   :  { %v922_v48 = vsel %vm202_vm6, %v1924_v1, %v921_v42  ;;  %929 = vst.msk [vmem:[#allocation4 + $0x58] sm:$0xff] %vm1888_vm13, %v923_v43  ;;  %v967_v50 = vpop.permute.xlu1 %966  ;;  %1254 = vmatpush1.bf16.msra.mxu1 %v1228_v45  ;;  %1287 = vmatpush1.bf16.msra.mxu0 %v1482_v40  ;;  %v1234_v8 = vsel %vm102_vm3, %v1506_v5, 0 }
 0x3e9   :  { %v970_v11 = vrot.slane %v967_v50, 4  ;;  %v1488_v51 = vcombine.low %v1957_v47, %v922_v48  ;;  %v1489_v52 = vcombine.high %v1957_v47, %v922_v48 }
 0x3eb   :  { %v973_v1 = vsel %vm102_vm3, %v969_v29, %v970_v11  ;;  %v975_v49 = vsel %vm297_vm8, %v967_v50, %v970_v11  ;;  %v1561_v54 = vld [vmem:[#allocation4 + $0x10] ss:$24 sps:$4 sm:$0xff]   ;;  %v1563_v55 = vld [vmem:[#allocation4 + $0x14] ss:$24 sps:$4 sm:$0xff]   ;;  %1511 = vmatmul.mubr.msk.bf16.vlgmr.msra.gmra.mrb[4].mxu1 %vm1223_vm4, %v1060_v56  ;;  %1288 = vmatprep.subr.bf16.mxu0 %v1489_v52 }
 0x3ec   :  { %v974_v57 = vsel %vm297_vm8, %v1929_v12, %v973_v1  ;;  %981 = vst.msk [vmem:[#allocation4 + $0x88] sm:$0xff] %vm1888_vm13, %v975_v49  ;;  %v1019_v58 = vpop.permute.xlu1 %1018  ;;  %1289 = vmatpush1.bf16.msra.mxu0 %v1488_v51  ;;  %1359 = vmatprep.mubr.bf16.mxu1 %v1588_v22 }
 0x3ed   :  { %v1022_v47 = vrot.slane %v1019_v58, 4  ;;  %1327 = vmatprep.subr.bf16.mxu1 %v1563_v55  ;;  %v1494_v29 = vcombine.low %v1968_v7, %v974_v57  ;;  %v1495_v59 = vcombine.high %v1968_v7, %v974_v57 }
 0x3ee   :  { %1328 = vmatpush1.bf16.msra.mxu1 %v1561_v54 }
 0x3ef   :  { %v1025_v60 = vsel %vm102_vm3, %v1021_v53, %v1022_v47  ;;  %v1027_v12 = vsel %vm392_vm10, %v1019_v58, %v1022_v47  ;;  %v1564_v62 = vld [vmem:[#allocation4 + $0x40] ss:$24 sps:$4 sm:$0xff]   ;;  %v1566_v0 = vld [vmem:[#allocation4 + $0x44] ss:$24 sps:$4 sm:$0xff]   ;;  %1290 = vmatprep.subr.bf16.mxu0 %v1495_v59 }
 0x3f0   :  { %v1026_v61 = vsel %vm392_vm10, %v1938_v30, %v1025_v60  ;;  %1033 = vst.msk [vmem:[#allocation4 + $0xb8] sm:$0xff] %vm1888_vm13, %v1027_v12  ;;  %1291 = vmatpush1.bf16.msra.mxu0 %v1494_v29  ;;  %1329 = vmatprep.subr.bf16.mxu1 %v1566_v0  ;;  %v1087_v30 = vld [vmem:[#allocation4 + $0xd0] sm:$0xff] }
 0x3f1   :  { %v1500_v22 = vcombine.low %v1977_v27, %v1026_v61  ;;  %v1501_v2 = vcombine.high %v1977_v27, %v1026_v61  ;;  %v1509_v9 = vcombine.high %v1087_v30, %v1087_v30  ;;  %v1508_v10 = vcombine.low %v1087_v30, %v1087_v30  ;;  %v1368_v29 = vld [vmem:[%s2076_s6] sm:$0xff] }
 0x3f2   :  { %1330 = vmatpush1.bf16.msra.mxu1 %v1564_v62  ;;  %v1369_v12 = vld [vmem:[%s2077_s7] sm:$0xff] }
 0x3f3   :  { %v1567_v13 = vld [vmem:[#allocation4 + $0x70] ss:$24 sps:$4 sm:$0xff]   ;;  %v1569_v53 = vld [vmem:[#allocation4 + $0x74] ss:$24 sps:$4 sm:$0xff]   ;;  %1292 = vmatprep.subr.bf16.mxu0 %v1501_v2  ;;  %v1240_v14 = vsel %vm102_vm3, %v1508_v10, 0 }
 0x3f4   :  { %1293 = vmatpush1.bf16.msra.mxu0 %v1500_v22  ;;  %1331 = vmatprep.subr.bf16.mxu1 %v1569_v53 }
 0x3f5   :  { %1512 = vmatprep.subr.msk.bf16.mxu0 %vm102_vm3, %v1507_v3 }
 0x3f6   :  { %1332 = vmatpush1.bf16.msra.mxu1 %v1567_v13 }
 0x3f7   :  { %v1570_v63 = vld [vmem:[#allocation4 + $0xa0] ss:$24 sps:$4 sm:$0xff]   ;;  %v1572_v7 = vld [vmem:[#allocation4 + $0xa4] ss:$24 sps:$4 sm:$0xff]  }
 0x3f8   :  { %1295 = vmatpush1.bf16.msra.mxu0 %v1234_v8  ;;  %1333 = vmatprep.subr.bf16.mxu1 %v1572_v7 }
 0x3fa   :  { %1334 = vmatpush1.bf16.msra.mxu1 %v1570_v63 }
 0x3fb   :  { %1514 = vmatprep.subr.msk.bf16.mxu1 %vm102_vm3, %v1509_v9  ;;  %1513 = vmatmul.mubr.msk.bf16.vlgmr.msra.gmra.mrb[8].mxu0 %vm1223_vm4, %v1060_v56 }
 0x3fe   :  { %1336 = vmatpush1.bf16.msra.mxu1 %v1240_v14 }
 0x401   :  { %1515 = vmatmul.mubr.msk.bf16.vlgmr.msra.gmra.mrb[8].mxu1 %vm1223_vm4, %v1060_v56 }
 0x4be   :  { %v1279_v15 = vpop.f32.mrb[4].mxu1 }
 0x4bf   :  { %v1370_v16 = vmul.f32 %v1279_v15, %v1819_v18  ;;  %v1281_v17 = vpop.f32.mrb[5].mxu1 }
 0x4c0   :  { %v1371_v21 = vmul.f32 %v1281_v17, %v1821_v19  ;;  %v1283_v25 = vpop.f32.mrb[6].mxu1 }
 0x4c1   :  { %v1384_v6 = vmul.f32 %v1370_v16, %v1279_v15  ;;  %v1284_v27 = vpop.f32.mrb[7].mxu1 }
 0x4c2   :  { %v1376_v28 = vadd.f32 %v1371_v21, %v1370_v16  ;;  %v1385_v26 = vmul.f32 %v1371_v21, %v1281_v17 }
 0x4c4   :  { %v1390_v31 = vadd.f32 %v1385_v26, %v1384_v6 }
 0x4ce   :  { %v1320_v32 = vpop.f32.mrb[8].mxu0 }
 0x4cf   :  { %v1372_v34 = vmul.f32 %v1320_v32, %v1837_v35  ;;  %v1322_v41 = vpop.f32.mrb[9].mxu0 }
 0x4d0   :  { %v1373_v44 = vmul.f32 %v1322_v41, %v1839_v36  ;;  %v1324_v46 = vpop.f32.mrb[10].mxu0 }
 0x4d1   :  { %v1377_v24 = vadd.f32 %v1376_v28, %v1372_v34  ;;  %v1386_v4 = vmul.f32 %v1372_v34, %v1320_v32  ;;  %v1325_v20 = vpop.f32.mrb[11].mxu0 }
 0x4d2   :  { %v1387_v18 = vmul.f32 %v1373_v44, %v1322_v41 }
 0x4d3   :  { %v1391_v23 = vadd.f32 %v1390_v31, %v1386_v4  ;;  %v1378_v39 = vadd.f32 %v1377_v24, %v1373_v44 }
 0x4d4   :  { %v1361_v19 = vpop.f32.mrb[8].mxu1 }
 0x4d5   :  { %v1374_v40 = vmul.f32 %v1361_v19, %v1841_v37  ;;  %v1363_v33 = vpop.f32.mrb[9].mxu1  ;;  %v1392_v42 = vadd.f32 %v1391_v23, %v1387_v18 }
 0x4d6   :  { %v1375_v43 = vmul.f32 %v1363_v33, %v1843_v38  ;;  %v1365_v45 = vpop.f32.mrb[10].mxu1 }
 0x4d7   :  { %v1388_v48 = vmul.f32 %v1374_v40, %v1361_v19  ;;  %v1366_v35 = vpop.f32.mrb[11].mxu1  ;;  %v1379_v50 = vadd.f32 %v1378_v39, %v1374_v40 }
 0x4d8   :  { %v1389_v56 = vmul.f32 %v1375_v43, %v1363_v33  ;;  %v1380_v36 = vsel %vm729_vm0, %v1375_v43, 0.0 }
 0x4d9   :  { %v1381_v11 = vadd.f32 %v1380_v36, %v1379_v50  ;;  %v1393_v51 = vadd.f32 %v1392_v42, %v1388_v48 }
 0x4da   :  { %v1394_v52 = vsel %vm729_vm0, %v1389_v56, 0.0 }
 0x4db   :  { %1382 = vadd.xlane.f32.xlu1 %v1381_v11  ;;  %v1395_v1 = vadd.f32 %v1394_v52, %v1393_v51 }
 0x4dd   :  { %1396 = vadd.xlane.f32.xlu0 %v1395_v1 }
 0x568   :  { %v1383_v49 = vpop.xlane.xlu1 %1382 }
 0x569   :  { %v1398_v37 = vmul.f32 0.001953125, %v1383_v49 }
 0x56a   :  { %v1397_v54 = vpop.xlane.xlu0 %1396 }
 0x56b   :  { %v1400_v55 = vmul.f32 %v1398_v37, %v1398_v37  ;;  %v1399_v57 = vmul.f32 0.001953125, %v1397_v54 }
 0x56d   :  { %v1401_v38 = vsub.f32 %v1399_v57, %v1400_v55 }
 0x56f   :  { %v1402_v58 = vmax.f32 %v1401_v38, 0.0 }
 0x571   :  { %v1403_v47 = vadd.f32 1e-05, %v1402_v58 }
 0x573   :  { %1577 = vrsqrt.f32 %v1403_v47 }
 0x57d   :  { %v1578_v59 = vpop.eup %1577 }
 0x57e   :  { %v1405_v60 = vmul.f32 %v1578_v59, %v1368_v29 }
 0x580   :  { %1410 = vperm.xlu0 %1530, %v1405_v60   ;;  %v1406_v62 = vmul.f32 %v1405_v60, %v1398_v37 }
 0x582   :  { %v1407_v0 = vsub.f32 %v1369_v12, %v1406_v62 }
 0x584   :  { %1421 = vperm.xlu1 %1531, %v1407_v0  }
 0x5ff   :  { %v1411_v61 = vpop.permute.xlu0 %1410 }
 0x600   :  { %v1413_v22 = vmul.f32 %v1411_v61, %v1279_v15  ;;  %v1414_v2 = vmul.f32 %v1411_v61, %v1281_v17  ;;  %v1415_v13 = vmul.f32 %v1411_v61, %v1320_v32  ;;  %v1416_v53 = vmul.f32 %v1411_v61, %v1322_v41 }
 0x601   :  { %v1417_v3 = vmul.f32 %v1411_v61, %v1361_v19  ;;  %v1418_v5 = vmul.f32 %v1411_v61, %v1363_v33 }
 0x603   :  { %v1422_v30 = vpop.permute.xlu1 %1421 }
 0x604   :  { %v1424_v63 = vadd.f32 %v1422_v30, %v1413_v22  ;;  %v1425_v7 = vadd.f32 %v1422_v30, %v1414_v2  ;;  %v1426_v8 = vadd.f32 %v1422_v30, %v1415_v13  ;;  %v1427_v9 = vadd.f32 %v1422_v30, %v1416_v53 }
 0x605   :  { %v1428_v10 = vadd.f32 %v1422_v30, %v1417_v3  ;;  %v1429_v14 = vadd.f32 %v1422_v30, %v1418_v5 }
 0x606   :  { %v1430_v16 = vmax.f32 %v1424_v63, 0.0  ;;  %v1431_v21 = vmax.f32 %v1425_v7, 0.0  ;;  %v1432_v25 = vmax.f32 %v1426_v8, 0.0  ;;  %v1433_v6 = vmax.f32 %v1427_v9, 0.0 }
 0x607   :  { %v1434_v27 = vmax.f32 %v1428_v10, 0.0  ;;  %v1435_v28 = vmax.f32 %v1429_v14, 0.0 }
 0x608   :  { %1436 = vst [vmem:[%s2078_s8] sm:$0xff] %v1430_v16  ;;  %1437 = vst [vmem:[%s2078_s8 + $0x8] sm:$0xff] %v1431_v21 }
 0x609   :  { %1438 = vst [vmem:[%s2078_s8 + $0x10] sm:$0xff] %v1432_v25  ;;  %1439 = vst [vmem:[%s2078_s8 + $0x18] sm:$0xff] %v1433_v6 }
 0x60a   :  { %1440 = vst [vmem:[%s2078_s8 + $0x20] sm:$0xff] %v1434_v27  ;;  %1441 = vst.msk [vmem:[%s2078_s8 + $0x28] sm:$0xff] %vm729_vm0, %v1435_v28 }

</bundles_post_ra>
